<compile_context>
chip_gen: v7x
topology: tpu7x:2x2x1
jax: 0.10.0
libtpu: 0.0.40
codegen_flags: <defaults>
</compile_context>

<pallas_src>
import math

import jax
import jax.numpy as jnp
from jax import lax
from jax.experimental import pallas as pl
from jax.experimental.pallas import tpu as pltpu


_INV_SQRT2 = 0.7071067811865476


def _round_up(x, m):
    return (x + m - 1) // m * m


def _output_process_kernel(x_ref, w1_ref, b1_ref, g_ref, be_ref,
                           w2_ref, b2_ref, o_ref):
    # x_ref: (TM, D)      w1_ref: (D, D) in (in, out) layout
    # b1/g/be: (1, D)     w2_ref: (D, Npad) in (in, out) layout
    # b2_ref: (1, Npad)   o_ref: (TM, Npad)
    x = x_ref[...]  # native dtype into the MXU; accumulate in f32

    # dense: h = x @ W1 + b1   (W1 already (in, out))
    h = jnp.dot(x, w1_ref[...], preferred_element_type=jnp.float32)
    h = h + b1_ref[...].astype(jnp.float32)

    # exact (erf) GELU -- matches F.gelu default.
    # TODO(synk): tanh-approx GELU would move work to the EUP slot but
    # changes numerics vs. the PyTorch module, so keep erf.
    h = 0.5 * h * (1.0 + lax.erf(h * _INV_SQRT2))

    # LayerNorm over last dim, eps=1e-12, biased variance, stats in f32.
    mean = jnp.mean(h, axis=-1, keepdims=True)
    c = h - mean
    var = jnp.mean(c * c, axis=-1, keepdims=True)
    hn = c * lax.rsqrt(var + 1e-12)
    hn = hn * g_ref[...].astype(jnp.float32) + be_ref[...].astype(jnp.float32)

    # poseFinal: y = hn @ W2 + b2  (W2 already (in, out), zero-padded cols)
    y = jnp.dot(hn.astype(x_ref.dtype), w2_ref[...],
                preferred_element_type=jnp.float32)
    y = y + b2_ref[...].astype(jnp.float32)

    o_ref[...] = y.astype(o_ref.dtype)


def _pick_tile_m(m, d, n_pad, itemsize):
    # At least 2 grid steps when m > 8 (v7x megacore), cap at 1024 rows to
    # amortize the ~0.35us/step overhead without blowing scoped VMEM.
    tile_m = max(8, _round_up(-(-m // 2), 8))
    tile_m = min(tile_m, 1024)
    # VMEM safety: double-buffered x/out tiles + ~2 f32 temps per element
    # should stay under ~16 MiB (default scoped limit is 32 MiB, weights and
    # Mosaic scratch need the rest).
    row_bytes = (d + n_pad) * (2 * itemsize + 8)
    max_tile = max(8, (16 * 1024 * 1024) // max(row_bytes, 1) // 8 * 8)
    return min(tile_m, max_tile)


def output_process(hidden_states, w_dense, b_dense, ln_gamma, ln_beta,
                   w_pose, b_pose):
    """Pallas implementation of OutputProcess.forward.

    Args:
      hidden_states: (seq, bs, latent_dim)
      w_dense: (latent_dim, latent_dim)   b_dense: (latent_dim,)
      ln_gamma, ln_beta: (latent_dim,)
      w_pose: (out_feats, latent_dim)     b_pose: (out_feats,)

    Returns:
      (bs, out_feats, seq), dtype = result_type(activations, weights)
    """
    seq, bs, d = hidden_states.shape
    out_feats = w_pose.shape[0]
    n_pad = _round_up(out_feats, 128)

    x_dtype = hidden_states.dtype
    out_dtype = jnp.result_type(hidden_states.dtype, w_pose.dtype)
    itemsize = jnp.dtype(x_dtype).itemsize

    # Flatten leading dims -- contiguous reshape, no data movement.
    x2d = hidden_states.reshape(seq * bs, d)
    m = seq * bs

    # One-time weight prep (constant-folds under jit with static weights):
    #   * transpose to (in, out) so the kernel matmuls are plain (M,K)x(K,N)
    #   * zero-pad poseFinal output columns to a lane-dense multiple of 128
    #   * cast weights to the activation dtype (f32 stays f32)
    w1t = jnp.transpose(w_dense).astype(x_dtype)                      # (D, D)
    w2t = jnp.pad(jnp.transpose(w_pose),
                  ((0, 0), (0, n_pad - out_feats))).astype(x_dtype)   # (D, Npad)
    b1 = b_dense.reshape(1, d)
    g2 = ln_gamma.reshape(1, d)
    be2 = ln_beta.reshape(1, d)
    b2p = jnp.pad(b_pose, (0, n_pad - out_feats)).reshape(1, n_pad)

    tile_m = _pick_tile_m(m, d, n_pad, itemsize)
    grid = (pl.cdiv(m, tile_m),)

    cost = pl.CostEstimate(
        flops=2 * m * d * (d + n_pad) + 10 * m * d,
        transcendentals=m * d,
        bytes_accessed=(m * d + m * n_pad + d * d + d * n_pad
                        + 4 * d + n_pad) * itemsize,
    )

    out2d = pl.pallas_call(
        _output_process_kernel,
        out_shape=jax.ShapeDtypeStruct((m, n_pad), out_dtype),
        grid_spec=pl.GridSpec(
            grid=grid,
            in_specs=[
                pl.BlockSpec((tile_m, d), lambda i: (i, 0)),   # x tile
                pl.BlockSpec((d, d), lambda i: (0, 0)),        # dense W (in,out)
                pl.BlockSpec((1, d), lambda i: (0, 0)),        # dense bias
                pl.BlockSpec((1, d), lambda i: (0, 0)),        # ln gamma
                pl.BlockSpec((1, d), lambda i: (0, 0)),        # ln beta
                pl.BlockSpec((d, n_pad), lambda i: (0, 0)),    # pose W (in,out)
                pl.BlockSpec((1, n_pad), lambda i: (0, 0)),    # pose bias
            ],
            out_specs=pl.BlockSpec((tile_m, n_pad), lambda i: (i, 0)),
        ),
        compiler_params=pltpu.CompilerParams(
            dimension_semantics=("parallel",),
        ),
        cost_estimate=cost,
    )(x2d, w1t, b1, g2, be2, w2t, b2p)

    # Trim lane padding, restore (seq, bs, out_feats), then permute(1, 2, 0).
    y = out2d.reshape(seq, bs, n_pad)[:, :, :out_feats]
    return jnp.transpose(y, (1, 2, 0))


def _reference(hidden, w1, b1, g, be, w2, b2):
    h = jnp.einsum("sbd,ed->sbe", hidden, w1) + b1
    h = 0.5 * h * (1.0 + jax.scipy.special.erf(h * _INV_SQRT2))
    mean = jnp.mean(h, axis=-1, keepdims=True)
    var = jnp.mean((h - mean) ** 2, axis=-1, keepdims=True)
    h = (h - mean) / jnp.sqrt(var + 1e-12) * g + be
    y = jnp.einsum("sbd,nd->sbn", h, w2) + b2
    return jnp.transpose(y, (1, 2, 0))


if __name__ == "__main__":
    # Small shapes consistent with the module's forward.
    seq, bs = 8, 2
    latent_dim, out_feats = 32, 16

    key = jax.random.PRNGKey(0)
    kx, kw1, kb1, kg, kbe, kw2, kb2 = jax.random.split(key, 7)

    hidden = jax.random.normal(kx, (seq, bs, latent_dim), dtype=jnp.float32)

    bound1 = 1.0 / math.sqrt(latent_dim)
    w_dense = jax.random.uniform(kw1, (latent_dim, latent_dim),
                                 minval=-bound1, maxval=bound1,
                                 dtype=jnp.float32)
    b_dense = jax.random.uniform(kb1, (latent_dim,), minval=-bound1,
                                 maxval=bound1, dtype=jnp.float32)

    ln_gamma = jnp.ones((latent_dim,), dtype=jnp.float32)
    ln_beta = jnp.zeros((latent_dim,), dtype=jnp.float32)

    w_pose = jax.random.uniform(kw2, (out_feats, latent_dim),
                                minval=-bound1, maxval=bound1,
                                dtype=jnp.float32)
    b_pose = jax.random.uniform(kb2, (out_feats,), minval=-bound1,
                                maxval=bound1, dtype=jnp.float32)

    out = output_process(hidden, w_dense, b_dense, ln_gamma, ln_beta,
                         w_pose, b_pose)
    out = jax.block_until_ready(out)

    ref = _reference(hidden, w_dense, b_dense, ln_gamma, ln_beta,
                     w_pose, b_pose)

    assert out.shape == (bs, out_feats, seq), out.shape
    assert jnp.allclose(out, ref, atol=1e-5, rtol=1e-5)

    print("KERNEL_OK")
</pallas_src>

<mosaic_0001>
module attributes {stable_mosaic.version = 11 : i64} {
  func.func @_output_process_kernel(%arg0: i32, %arg1: memref<8x32xf32, #tpu.memory_space<vmem>>, %arg2: memref<32x32xf32, #tpu.memory_space<vmem>>, %arg3: memref<1x32xf32, #tpu.memory_space<vmem>>, %arg4: memref<1x32xf32, #tpu.memory_space<vmem>>, %arg5: memref<1x32xf32, #tpu.memory_space<vmem>>, %arg6: memref<32x128xf32, #tpu.memory_space<vmem>>, %arg7: memref<1x128xf32, #tpu.memory_space<vmem>>, %arg8: memref<8x128xf32, #tpu.memory_space<vmem>>) attributes {dimension_semantics = [#tpu.dimension_semantics<parallel>], iteration_bounds = array<i64: 2>, scalar_prefetch = 0 : i64, scratch_operands = 0 : i64, tpu.core_type = #tpu.core_type<tc>, window_params = [{transform_indices = @transform_0, window_bounds = array<i64: 8, 32>}, {pipeline_mode = #tpu.pipeline_mode<synchronous>, transform_indices = @transform_1, window_bounds = array<i64: 32, 32>}, {pipeline_mode = #tpu.pipeline_mode<synchronous>, transform_indices = @transform_2, window_bounds = array<i64: 1, 32>}, {pipeline_mode = #tpu.pipeline_mode<synchronous>, transform_indices = @transform_3, window_bounds = array<i64: 1, 32>}, {pipeline_mode = #tpu.pipeline_mode<synchronous>, transform_indices = @transform_4, window_bounds = array<i64: 1, 32>}, {pipeline_mode = #tpu.pipeline_mode<synchronous>, transform_indices = @transform_5, window_bounds = array<i64: 32, 128>}, {pipeline_mode = #tpu.pipeline_mode<synchronous>, transform_indices = @transform_6, window_bounds = array<i64: 1, 128>}, {transform_indices = @transform_7, window_bounds = array<i64: 8, 128>}]} {
    %c0 = arith.constant 0 : index
    %c0_0 = arith.constant 0 : index
    %0 = vector.load %arg1[%c0, %c0_0] : memref<8x32xf32, #tpu.memory_space<vmem>>, vector<8x32xf32>
    %c0_1 = arith.constant 0 : index
    %c0_2 = arith.constant 0 : index
    %1 = vector.load %arg2[%c0_1, %c0_2] : memref<32x32xf32, #tpu.memory_space<vmem>>, vector<32x32xf32>
    %cst = arith.constant dense<0.000000e+00> : vector<8x32xf32>
    %2 = tpu.matmul %0, %1, %cst {dimension_numbers = #tpu.dot_dimension_numbers<[1], [0], [0], [1], [0, 0, 1, 1], [], []>} : vector<8x32xf32>, vector<32x32xf32>, vector<8x32xf32> -> vector<8x32xf32>
    %c0_3 = arith.constant 0 : index
    %c0_4 = arith.constant 0 : index
    %3 = vector.load %arg3[%c0_3, %c0_4] : memref<1x32xf32, #tpu.memory_space<vmem>>, vector<1x32xf32>
    %4 = vector.broadcast %3 : vector<1x32xf32> to vector<8x32xf32>
    %5 = arith.addf %2, %4 : vector<8x32xf32>
    %cst_5 = arith.constant 5.000000e-01 : f32
    %6 = vector.broadcast %cst_5 : f32 to vector<8x32xf32>
    %7 = arith.mulf %6, %5 : vector<8x32xf32>
    %cst_6 = arith.constant 0.707106769 : f32
    %8 = vector.broadcast %cst_6 : f32 to vector<8x32xf32>
    %9 = arith.mulf %5, %8 : vector<8x32xf32>
    %10 = math.erf %9 : vector<8x32xf32>
    %cst_7 = arith.constant 1.000000e+00 : f32
    %11 = vector.broadcast %cst_7 : f32 to vector<8x32xf32>
    %12 = arith.addf %11, %10 : vector<8x32xf32>
    %13 = arith.mulf %7, %12 : vector<8x32xf32>
    %cst_8 = arith.constant dense<0.000000e+00> : vector<8xf32>
    %14 = vector.multi_reduction <add>, %13, %cst_8 [1] : vector<8x32xf32> to vector<8xf32>
    %15 = vector.shape_cast %14 : vector<8xf32> to vector<8x1xf32>
    %cst_9 = arith.constant 3.200000e+01 : f32
    %16 = vector.broadcast %cst_9 : f32 to vector<8x1xf32>
    %17 = arith.divf %15, %16 : vector<8x1xf32>
    %18 = vector.broadcast %17 : vector<8x1xf32> to vector<8x32xf32>
    %19 = arith.subf %13, %18 : vector<8x32xf32>
    %20 = arith.mulf %19, %19 : vector<8x32xf32>
    %cst_10 = arith.constant dense<0.000000e+00> : vector<8xf32>
    %21 = vector.multi_reduction <add>, %20, %cst_10 [1] : vector<8x32xf32> to vector<8xf32>
    %22 = vector.shape_cast %21 : vector<8xf32> to vector<8x1xf32>
    %cst_11 = arith.constant 3.200000e+01 : f32
    %23 = vector.broadcast %cst_11 : f32 to vector<8x1xf32>
    %24 = arith.divf %22, %23 : vector<8x1xf32>
    %cst_12 = arith.constant 9.99999996E-13 : f32
    %25 = vector.broadcast %cst_12 : f32 to vector<8x1xf32>
    %26 = arith.addf %24, %25 : vector<8x1xf32>
    %27 = math.rsqrt %26 : vector<8x1xf32>
    %28 = vector.broadcast %27 : vector<8x1xf32> to vector<8x32xf32>
    %29 = arith.mulf %19, %28 : vector<8x32xf32>
    %c0_13 = arith.constant 0 : index
    %c0_14 = arith.constant 0 : index
    %30 = vector.load %arg4[%c0_13, %c0_14] : memref<1x32xf32, #tpu.memory_space<vmem>>, vector<1x32xf32>
    %31 = vector.broadcast %30 : vector<1x32xf32> to vector<8x32xf32>
    %32 = arith.mulf %29, %31 : vector<8x32xf32>
    %c0_15 = arith.constant 0 : index
    %c0_16 = arith.constant 0 : index
    %33 = vector.load %arg5[%c0_15, %c0_16] : memref<1x32xf32, #tpu.memory_space<vmem>>, vector<1x32xf32>
    %34 = vector.broadcast %33 : vector<1x32xf32> to vector<8x32xf32>
    %35 = arith.addf %32, %34 : vector<8x32xf32>
    %c0_17 = arith.constant 0 : index
    %c0_18 = arith.constant 0 : index
    %36 = vector.load %arg6[%c0_17, %c0_18] : memref<32x128xf32, #tpu.memory_space<vmem>>, vector<32x128xf32>
    %cst_19 = arith.constant dense<0.000000e+00> : vector<8x128xf32>
    %37 = tpu.matmul %35, %36, %cst_19 {dimension_numbers = #tpu.dot_dimension_numbers<[1], [0], [0], [1], [0, 0, 1, 1], [], []>} : vector<8x32xf32>, vector<32x128xf32>, vector<8x128xf32> -> vector<8x128xf32>
    %c0_20 = arith.constant 0 : index
    %c0_21 = arith.constant 0 : index
    %38 = vector.load %arg7[%c0_20, %c0_21] : memref<1x128xf32, #tpu.memory_space<vmem>>, vector<1x128xf32>
    %39 = vector.broadcast %38 : vector<1x128xf32> to vector<8x128xf32>
    %40 = arith.addf %37, %39 : vector<8x128xf32>
    %c0_22 = arith.constant 0 : index
    %c0_23 = arith.constant 0 : index
    %41 = vector.load %arg8[%c0_22, %c0_23] : memref<8x128xf32, #tpu.memory_space<vmem>>, vector<8x128xf32>
    tpu.vector_store %arg8[%c0_22, %c0_23], %40 {strides = array<i32>} : memref<8x128xf32, #tpu.memory_space<vmem>>, vector<8x128xf32>,
    return
  }
  func.func @transform_0(%arg0: i32) -> (i32, i32) {
    %c0_i32 = arith.constant 0 : i32
    %c0_i32_0 = arith.constant 0 : i32
    return %arg0, %c0_i32 : i32, i32
  }
  func.func @transform_1(%arg0: i32) -> (i32, i32) {
    %c0_i32 = arith.constant 0 : i32
    %c0_i32_0 = arith.constant 0 : i32
    %c0_i32_1 = arith.constant 0 : i32
    return %c0_i32, %c0_i32_0 : i32, i32
  }
  func.func @transform_2(%arg0: i32) -> (i32, i32) {
    %c0_i32 = arith.constant 0 : i32
    %c0_i32_0 = arith.constant 0 : i32
    %c0_i32_1 = arith.constant 0 : i32
    return %c0_i32, %c0_i32_0 : i32, i32
  }
  func.func @transform_3(%arg0: i32) -> (i32, i32) {
    %c0_i32 = arith.constant 0 : i32
    %c0_i32_0 = arith.constant 0 : i32
    %c0_i32_1 = arith.constant 0 : i32
    return %c0_i32, %c0_i32_0 : i32, i32
  }
  func.func @transform_4(%arg0: i32) -> (i32, i32) {
    %c0_i32 = arith.constant 0 : i32
    %c0_i32_0 = arith.constant 0 : i32
    %c0_i32_1 = arith.constant 0 : i32
    return %c0_i32, %c0_i32_0 : i32, i32
  }
  func.func @transform_5(%arg0: i32) -> (i32, i32) {
    %c0_i32 = arith.constant 0 : i32
    %c0_i32_0 = arith.constant 0 : i32
    %c0_i32_1 = arith.constant 0 : i32
    return %c0_i32, %c0_i32_0 : i32, i32
  }
  func.func @transform_6(%arg0: i32) -> (i32, i32) {
    %c0_i32 = arith.constant 0 : i32
    %c0_i32_0 = arith.constant 0 : i32
    %c0_i32_1 = arith.constant 0 : i32
    return %c0_i32, %c0_i32_0 : i32, i32
  }
  func.func @transform_7(%arg0: i32) -> (i32, i32) {
    %c0_i32 = arith.constant 0 : i32
    %c0_i32_0 = arith.constant 0 : i32
    return %arg0, %c0_i32 : i32, i32
  }
}

</mosaic_0001>

<bundles_post_ra>
// kernel: tpu_custom_call.1
= control target key start
LH: loop header
LB: loop body
LE: loop exit
PB: predicated region body
PF: predicated region fallthrough
CT: control target
= control target key end

     0   :  { %12 = vsyncpa [#allocation3], 0  ;;  %s1230_s0 = inlined_call_operand.hbm [shape: f32[16,32], index: 0, kind: input, shape index: {}]   ;;  %s1231_s1 = inlined_call_operand.hbm [shape: f32[32,32], index: 1, kind: input, shape index: {}]   ;;  %s1232_s2 = inlined_call_operand.vmem [shape: f32[1,32], index: 2, kind: input, shape index: {}]   ;;  %s1233_s3 = inlined_call_operand.vmem [shape: f32[1,32], index: 3, kind: input, shape index: {}]   ;;  %s1234_s4 = inlined_call_operand.vmem [shape: f32[1,32], index: 4, kind: input, shape index: {}]   ;;  %s1235_s5 = inlined_call_operand.hbm [shape: f32[32,128], index: 5, kind: input, shape index: {}]   ;;  %s1236_s6 = inlined_call_operand.vmem [shape: f32[1,128], index: 6, kind: input, shape index: {}]   ;;  %s1237_s7 = inlined_call_operand.hbm [shape: f32[16,128], index: 7, kind: output, shape index: {}]  }
   0x1   :  { %14 = vsyncpa [#allocation3 + $0x1], 0 }
   0x2   :  { %15 = vsyncpa [#allocation6], 0 }
   0x3   :  { %16 = vsyncpa [#allocation4], 0 }
   0x4   :  { %18 = vsyncpa [#allocation4 + $0x1], 0  ;;  %s981_s24 = smov 0   ;;  %s983_s25 = smov 0  }
   0x5   :  { %s985_s26 = smov 0   ;;  %s987_s27 = smov 0  }
   0x6 LB: > { %s1002_s28 = sadd.s32 4294967295, %s930_s27   ;;  %s632_s29 = sadd.s32 4294967294, %s930_s27   ;;  %s930_s27 = sphi %s987_s27, %s1257_s27   ;;  %s926_s26 = sphi %s985_s26, %s1256_s26   ;;  %s922_s25 = sphi %s983_s25, %s1255_s25   ;;  %s918_s24 = sphi %s981_s24, %s1254_s24  }
   0x7   : > { %p44_p0 = scmp.ne.s32.totalorder %s922_s25, %s918_s24  ;;  %p1238_p1 = scmp.eq.s32.totalorder %s1002_s28, 0 }
   0x8   : > { %p200_p3 = scmp.eq.s32.totalorder %s632_s29, 1  ;;  %p633_p5 = scmp.ge.s32.totalorder %s930_s27, 1 }
   0x9   : > { %p1011_p4 = por %p1238_p1, %p44_p0  ;;  %p207_p7 = scmp.lt.s32.totalorder %s930_s27, 3 }
   0xa   : > { %p1016_p6 = por %p200_p3, %p44_p0  ;;  %s932_s10 = smov [#allocation5]  }
   0xb   : > { %s1241_s30 = scalar_select %p1011_p4, 1, 0 }
   0xc   : > { %s1242_s8 = scalar_select %p1016_p6, 1, 0 }
   0xd   : > { %p1021_p8 = pnand %p633_p5, %p207_p7  ;;  %s219_s11 = sshll.u32 %s932_s10, 4  ;;  %s1025_s11 = int_to_ptr.vmem [resolvable:$true] %s219_s11 }
   0xe   : > { %s933_s13 = smov [#allocation7]   ;;  %s774_s17 = scalar_lea.hbm %s1231_s1, 512 }
   0xf   : > { %p710_p9 = pneg %p1021_p8  ;;  %s241_s14 = sshll.u32 %s933_s13, 4  ;;  %s1036_s14 = int_to_ptr.vmem [resolvable:$true] %s241_s14 }
  0x10   : > { %p775_p12 = scmp.ne.s32.totalorder %s1231_s1, %s774_s17  ;;  %p781_p5 = scmp.lt.u32.totalorder %s774_s17, %s1231_s1 }
  0x11   : > { %p1032_p11 = pnand %p710_p9, %p1238_p1 }
  0x13   : > { %p776_p13 = pneg %p1032_p11 }
  0x15   : > { %p777_p0 = pnand %p776_p13, %p775_p12 }
  0x17   : > { %p778_p3 = pneg %p777_p0 }
  0x19   : > { %p783_p7 = pnand %p781_p5, %p778_p3 }
  0x1b   : > { %786 = shalt.err (!%p783_p7)
}
  0x1c   : > { %s787_s22 = scalar_lea.vmem %s1025_s11, 512  ;;  %p795_p2 = scmp.lt.s32.totalorder %s1025_s11, %s1025_s11 }
  0x1d   : > { %p788_p9 = scmp.ne.s32.totalorder %s1025_s11, %s787_s22  ;;  %p796_p12 = scmp.lt.s32.totalorder %s787_s22, %s787_s22 }
  0x1f   : > { %p790_p10 = pnand %p788_p9, %p776_p13  ;;  %p797_p0 = por %p796_p12, %p795_p2 }
  0x21   : > { %p791_p1 = pneg %p790_p10 }
  0x23   : > { %p798_p6 = pnand %p797_p0, %p791_p1 }
  0x25   : > { %801 = shalt.err (!%p798_p6)
}
  0x26   : > { %s934_s23 = smov 128   ;;  %s935_s29 = smov 8  }
  0x27   : > { %713 = dma.hbm_to_vmem [thread:$0]  (!%p1032_p11), %s1231_s1, 512, %s1025_s11, [#allocation6], %s934_s23, %s934_s23, %s935_s29  }
  0x28   : > { %s802_s17 = scalar_lea.hbm %s1235_s5, 512 }
  0x29   : > { %p803_p2 = scmp.ne.s32.totalorder %s1235_s5, %s802_s17  ;;  %p809_p10 = scmp.lt.u32.totalorder %s802_s17, %s1235_s5 }
  0x2b   : > { %p805_p1 = pnand %p803_p2, %p776_p13 }
  0x2d   : > { %p806_p6 = pneg %p805_p1 }
  0x2f   : > { %p811_p3 = pnand %p809_p10, %p806_p6 }
  0x31   : > { %814 = shalt.err (!%p811_p3)
}
  0x32   : > { %s815_s11 = scalar_lea.vmem %s1036_s14, 512  ;;  %p823_p12 = scmp.lt.s32.totalorder %s1036_s14, %s1036_s14 }
  0x33   : > { %p816_p5 = scmp.ne.s32.totalorder %s1036_s14, %s815_s11  ;;  %p824_p0 = scmp.lt.s32.totalorder %s815_s11, %s815_s11 }
  0x35   : > { %p818_p7 = pnand %p816_p5, %p776_p13  ;;  %p825_p2 = por %p824_p0, %p823_p12 }
  0x37   : > { %p819_p9 = pneg %p818_p7 }
  0x39   : > { %p826_p1 = pnand %p825_p2, %p819_p9 }
  0x3b   : > { %829 = shalt.err (!%p826_p1)
}
  0x3c   : > { %716 = dma.hbm_to_vmem [thread:$0]  (!%p1032_p11), %s1235_s5, 512, %s1036_s14, [#allocation6], %s934_s23, %s934_s23, %s935_s29  }
  0x3d   : > { %s1091_s13 = sadd.s32 1, %s930_s27   ;;  %s31_s12 = sadd.s32 1, %s926_s26 }
  0x3e   : > { %s28_s15 = ssub.s32 %s930_s27, %s1091_s13  ;;  %p38_p13 = scmp.ne.s32.totalorder %s926_s26, %s922_s25 }
  0x3f   : > { %p29_p6 = scmp.eq.s32.totalorder %s28_s15, 0  ;;  %p39_p10 = scmp.eq.s32.totalorder %s930_s27, 0 }
  0x40   : > { %p1245_p3 = scmp.eq.s32.totalorder %s1002_s28, 1  ;;  %p727_p7 = scmp.lt.s32.totalorder %s930_s27, 2 }
  0x41   : > { %s1107_s17 = scalar_select %p29_p6, %s926_s26, %s31_s12  }
  0x42   : > { %p1101_p5 = por %p1245_p3, %p38_p13  ;;  %p40_p9 = por %p39_p10, %p38_p13 }
  0x43   : > { %s258_s18 = sand.u32 1, %s926_s26   ;;  %s638_s14 = sshll.u32 %s930_s27, 7 }
  0x44   : > { %s1246_s16 = scalar_select %p1101_p5, 1, 0 }
  0x45   : > { %s637_s19 = sshll.u32 %s258_s18, 3  ;;  %s1114_s20 = scalar_lea.hbm %s1230_s0, %s638_s14 }
  0x46   : > { %s262_s21 = scalar_lea.vmem [#allocation2], %s637_s19  ;;  %p1118_p11 = pnand %p727_p7, %p40_p9 }
  0x47   : > { %s269_s11 = sshll.u32 %s262_s21, 4  ;;  %s259_s10 = scalar_lea.sflag [#allocation3], %s258_s18  ;;  %s1116_s11 = int_to_ptr.vmem [resolvable:$true] %s269_s11 }
  0x48   : > { %s830_s12 = scalar_lea.hbm %s1114_s20, 128  ;;  %p832_p0 = pneg %p1118_p11 }
  0x49   : > { %p831_p12 = scmp.ne.s32.totalorder %s1114_s20, %s830_s12  ;;  %s835_s14 = scalar_lea.hbm %s1230_s0, 256 }
  0x4a   : > { %p836_p13 = scmp.lt.u32.totalorder %s1114_s20, %s1230_s0  ;;  %p837_p6 = scmp.lt.u32.totalorder %s835_s14, %s830_s12 }
  0x4b   : > { %p833_p2 = pnand %p832_p0, %p831_p12  ;;  %p839_p3 = scmp.lt.u32.totalorder %s830_s12, %s1114_s20 }
  0x4c   : > { %p838_p10 = por %p837_p6, %p836_p13 }
  0x4d   : > { %p834_p1 = pneg %p833_p2 }
  0x4e   : > { %p840_p7 = por %p839_p3, %p838_p10 }
  0x50   : > { %p841_p9 = pnand %p840_p7, %p834_p1 }
  0x52   : > { %844 = shalt.err (!%p841_p9)
}
  0x53   : > { %s845_s18 = scalar_lea.vmem %s1116_s11, 128  ;;  %s936_s21 = smov [#allocation2]  }
  0x54   : > { %p846_p12 = scmp.ne.s32.totalorder %s1116_s11, %s845_s18  ;;  %s850_s15 = sshll.u32 %s936_s21, 4  ;;  %s851_s15 = int_to_ptr.vmem [resolvable:$false] %s850_s15 }
  0x55   : > { %s852_s19 = scalar_lea.vmem %s851_s15, 256  ;;  %p853_p4 = scmp.lt.s32.totalorder %s1116_s11, %s851_s15 }
  0x56   : > { %p848_p2 = pnand %p846_p12, %p832_p0  ;;  %p854_p13 = scmp.lt.s32.totalorder %s852_s19, %s845_s18 }
  0x58   : > { %p849_p5 = pneg %p848_p2  ;;  %p855_p6 = por %p854_p13, %p853_p4 }
  0x5a   : > { %p856_p10 = pnand %p855_p6, %p849_p5 }
  0x5c   : > { %859 = shalt.err (!%p856_p10)
}
  0x5d   : > { %720 = dma.hbm_to_vmem [thread:$0]  (!%p1118_p11), %s1114_s20, 128, %s1116_s11, %s259_s10  }
  0x5e   : > { %278 = sbr.rel (%p1021_p8) target bundleno = 887 (0x377), region = 48  ;;  %s1150_s12 = sand.u32 (!%p1021_p8), 1, %s922_s25  }
  0x5f   : > { %s640_s14 = sshll.u32 (!%p1021_p8), %s1150_s12, 3  ;;  %s281_s23 = scalar_lea.sflag (!%p1021_p8), [#allocation3], %s1150_s12 }
  0x60   : > { %s284_s29 = scalar_lea.vmem (!%p1021_p8), [#allocation2], %s640_s14  ;;  %p1248_p4 = scmp.ne.s32.totalorder (!%p1021_p8), %s1241_s30, 0 }
  0x65   : > { %905 = dma.done.wait (%p1248_p4), %s281_s23, 128  }
  0x66   : > { %907 = vsyncadd (%p1248_p4), %s281_s23, 4294967168  ;;  %p1249_p5 = scmp.eq.s32.totalorder %s1002_s28, 0 }
  0x68   : > { %909 = dma.done.wait (%p1249_p5), [#allocation6], 1024   ;;  %p1250_p8 = pmov %p1249_p5 }
  0x69   : > { %v937_v0 = vmov 0.0|0.0   ;;  %vm938_vm0 = vmmov 0   ;;  %v939_v1 = vmov 0.0   ;;  %v324_v2 = vld [vmem:[#allocation5] sm:$0xff]  ;;  %v325_v3 = vld [vmem:[#allocation5 + $0x8] sm:$0xff]  ;;  %v326_v4 = vld [vmem:[#allocation5 + $0x10] sm:$0xff] }
  0x6a   : > { %911 = vsyncadd (%p1250_p8), [#allocation6], 4294966272  ;;  %686 = vmatprep.subr.bf16.mxu0 %v937_v0  ;;  %672 = vmatprep.mubr.msk.f32.mxu0 %vm938_vm0, %v939_v1  ;;  %v687_v5 = vpack.c.bf16 %v325_v3, %v324_v2  ;;  %v327_v6 = vld [vmem:[#allocation5 + $0x18] sm:$0xff]  ;;  %vm335_vm1 = vcmask 261120   ;;  %v644_v9 = vld [vmem:[%s1232_s2] ss:$0 sm:$0xff] }
  0x6b   : > { %692 = vmatprep.subr.bf16.mxu1 %v937_v0  ;;  %683 = vmatprep.mubr.msk.f32.mxu1 %vm938_vm0, %v939_v1  ;;  %v690_v7 = vpack.c.bf16 %v327_v6, %v326_v4  ;;  %v323_v8 = vld [vmem:[%s284_s29] sm:$0xff]  ;;  %v444_v24 = vld [vmem:[#allocation7] sm:$0xff]  ;;  %v445_v25 = vld [vmem:[#allocation7 + $0x8] sm:$0xff]  ;;  %s651_s15 = sshll.u32 %s1002_s28, 7  ;;  %s322_s19 = scalar_lea.vmem [#allocation8], %s640_s14 }
  0x6c   : > { %688 = vmatpush3.bf16.msra.mxu0 %v687_v5  ;;  %v446_v26 = vld [vmem:[#allocation7 + $0x10] sm:$0xff]  ;;  %v693_v27 = vpack.c.bf16 %v445_v25, %v444_v24  ;;  %v447_v28 = vld [vmem:[#allocation7 + $0x18] sm:$0xff]  ;;  %s543_s23 = sshll.u32 %s322_s19, 4  ;;  %s1186_s9 = scalar_lea.hbm %s1237_s7, %s651_s15  ;;  %s1188_s23 = int_to_ptr.vmem [resolvable:$true] %s543_s23 }
  0x6d   : > { %689 = vmatprep.subr.bf16.mxu0 %v937_v0  ;;  %v696_v29 = vpack.c.bf16 %v447_v28, %v446_v26  ;;  %v646_v34 = vld [vmem:[%s1233_s3] ss:$0 sm:$0xff]  ;;  %s530_s20 = scalar_lea.sflag [#allocation4], %s1150_s12  ;;  %s860_s11 = scalar_lea.vmem %s1188_s23, 128 }
  0x6e   : > { %694 = vmatpush3.bf16.msra.mxu1 %v693_v27  ;;  %v647_v36 = vld [vmem:[%s1234_s4] ss:$0 sm:$0xff]  ;;  %p861_p11 = scmp.ne.s32.totalorder %s1188_s23, %s860_s11  ;;  %p1251_p0 = scmp.ne.s32.totalorder %s1246_s16, 0 }
  0x6f   : > { %695 = vmatprep.subr.bf16.mxu1 %v937_v0  ;;  %v648_v39 = vld [vmem:[%s1236_s6] ss:$0 sm:$0xff]  ;;  %s940_s28 = smov [#allocation8]  }
  0x70   : > { %691 = vmatpush3.bf16.msra.mxu0 %v690_v7  ;;  %p862_p1 = pnand %p861_p11, %p1251_p0  ;;  %s864_s14 = sshll.u32 %s940_s28, 4  ;;  %s865_s14 = int_to_ptr.vmem [resolvable:$false] %s864_s14 }
  0x71   : > { %s866_s22 = scalar_lea.vmem %s865_s14, 256  ;;  %p867_p7 = scmp.lt.s32.totalorder %s1188_s23, %s865_s14 }
  0x72   : > { %697 = vmatpush3.bf16.msra.mxu1 %v696_v29  ;;  %p863_p3 = pneg %p862_p1  ;;  %p868_p9 = scmp.lt.s32.totalorder %s866_s22, %s860_s11 }
  0x73   : > { %673 = vmatmul.mubr.msk.f32.vlgmr.msra.gmra.mrb[0].mxu0 %vm335_vm1, %v323_v8 }
  0x74   : > { %p869_p12 = por %p868_p9, %p867_p7 }
  0x76   : > { %p870_p2 = pnand %p869_p12, %p863_p3 }
 0x146   : > { %v405_v10 = vpop.f32.mrb[0].mxu0 }
 0x147   : > { %v406_v11 = vadd.f32 %v644_v9, %v405_v10  ;;  %v674_v12 = vpop.f32.mrb[1].mxu0 }
 0x149   : > { %v410_v13 = vmul.f32 0.70710677, %v406_v11  ;;  %v409_v15 = vmul.f32 0.5, %v406_v11 }
 0x14b   : > { %770 = verf.f32 %v410_v13 }
 0x155   : > { %v771_v14 = vpop.eup %770 }
 0x156   : > { %v412_v16 = vadd.f32 1.0, %v771_v14 }
 0x158   : > { %v413_v17 = vmul.f32 %v412_v16, %v409_v15 }
 0x15a   : > { %v414_v18 = vsel %vm335_vm1, %v413_v17, 0.0 }
 0x15b   : > { %415 = vadd.xlane.f32.xlu0 %v414_v18 }
 0x1e8   : > { %v416_v19 = vpop.xlane.xlu0 %415 }
 0x1e9   : > { %v418_v20 = vmul.f32 0.03125, %v416_v19 }
 0x1eb   : > { %v419_v21 = vsub.f32 %v413_v17, %v418_v20 }
 0x1ed   : > { %v420_v22 = vmul.f32 %v419_v21, %v419_v21 }
 0x1ef   : > { %v421_v23 = vsel %vm335_vm1, %v420_v22, 0.0 }
 0x1f0   : > { %422 = vadd.xlane.f32.xlu0 %v421_v23 }
 0x27d   : > { %v423_v30 = vpop.xlane.xlu0 %422 }
 0x27e   : > { %v424_v31 = vmul.f32 0.03125, %v423_v30 }
 0x280   : > { %v425_v32 = vadd.f32 1e-12, %v424_v31 }
 0x282   : > { %772 = vrsqrt.f32 %v425_v32 }
 0x28c   : > { %v773_v33 = vpop.eup %772 }
 0x28d   : > { %v427_v35 = vmul.f32 %v773_v33, %v419_v21 }
 0x28f   : > { %v435_v37 = vmul.f32 %v646_v34, %v427_v35 }
 0x291   : > { %v443_v38 = vadd.f32 %v647_v36, %v435_v37 }
 0x293   : > { %684 = vmatmul.mubr.msk.f32.vlgmr.msra.gmra.mrb[0].mxu1 %vm335_vm1, %v443_v38 }
 0x366   : > { %v524_v40 = vpop.f32.mrb[0].mxu1 }
 0x367   : > { %v525_v41 = vadd.f32 %v648_v39, %v524_v40  ;;  %v685_v42 = vpop.f32.mrb[1].mxu1 }
 0x369   : > { %528 = vst [vmem:[%s322_s19] sm:$0xff] %v525_v41 }
 0x36a   : > { %873 = shalt.err (!%p870_p2)
}
 0x36b   : > { %s874_s12 = scalar_lea.hbm %s1186_s9, 128  ;;  %s878_s21 = scalar_lea.hbm %s1237_s7, 256 }
 0x36c   : > { %p875_p13 = scmp.ne.s32.totalorder %s1186_s9, %s874_s12  ;;  %p879_p4 = scmp.lt.u32.totalorder %s1186_s9, %s1237_s7 }
 0x36d   : > { %p880_p5 = scmp.lt.u32.totalorder %s878_s21, %s874_s12  ;;  %p882_p11 = scmp.lt.u32.totalorder %s874_s12, %s1186_s9 }
 0x36e   : > { %p876_p6 = pnand %p875_p13, %p1251_p0 }
 0x36f   : > { %p881_p8 = por %p880_p5, %p879_p4 }
 0x370   : > { %p877_p10 = pneg %p876_p6 }
 0x371   : > { %p883_p1 = por %p882_p11, %p881_p8 }
 0x373   : > { %p884_p3 = pnand %p883_p1, %p877_p10 }
 0x375   : > { %887 = shalt.err (!%p884_p3)
}
 0x376   : > { %708 = dma.vmem_to_hbm [thread:$0]  (%p1251_p0), %s1188_s23, 128, %s1186_s9, %s530_s20  }
 0x377 PF: > { %s555_s29 = sand.u32 1, %s918_s24   ;;  %p1252_p7 = scmp.ne.s32.totalorder %s1242_s8, 0 }
 0x378   : > { %p1253_p9 = scmp.ge.s32.totalorder %s930_s27, 2  ;;  %s556_s30 = scalar_lea.sflag [#allocation4], %s555_s29 }
 0x37a   : > { %p722_p12 = pnand %p1253_p9, %p1252_p7 }
 0x37c   : > { %913 = dma.done.wait (!%p722_p12), %s556_s30, 128  }
 0x37d   : > { %915 = vsyncadd (!%p722_p12), %s556_s30, 4294967168  ;;  %p21_p2 = scmp.ge.s32.totalorder %s1091_s13, 4   ;;  %s1254_s24 = smov %s922_s25 }
 0x37e   : > { %s1255_s25 = smov %s926_s26  ;;  %s1256_s26 = smov %s1107_s17 }
 0x37f   : > { %s1257_s27 = smov %s1091_s13  ;;  %23 = sbr.rel (!%p21_p2) target bundleno = 6 (0x6), region = 101 }
 0x386   :  { %561 = vsyncpa [#allocation3], 1 }
 0x387   :  { %563 = vsyncpa [#allocation3 + $0x1], 1 }
 0x388   :  { %564 = vsyncpa [#allocation6], 1 }
 0x389   :  { %565 = vsyncpa [#allocation4], 1 }
 0x38a   :  { %567 = vsyncpa [#allocation4 + $0x1], 1 }

</bundles_post_ra>
